<compile_context>
chip_gen: v7x
topology: tpu7x:2x2x1
jax: 0.10.0
libtpu: 0.0.40
codegen_flags: <defaults>
</compile_context>

<pallas_src>
import jax
import jax.numpy as jnp
from jax.experimental import pallas as pl
from jax.experimental.pallas import tpu as pltpu


def gcn_kernel(x_ref, adj_ref, w_ref, w2_row_ref, out_ref):
    # One grid step == one graph. adj / W / W2 are the same block every step
    # (constant index_map), so they stay resident in VMEM.
    adj = adj_ref[...]                                               # [N, N]
    x = x_ref[...]                                                   # [N, F]

    # Layer 1 (re-associated): relu((A @ X) @ W)
    ax = jnp.dot(adj, x, preferred_element_type=jnp.float32)        # [N, F]
    h = jnp.maximum(
        jnp.dot(ax, w_ref[...], preferred_element_type=jnp.float32), 0.0
    )                                                                # [N, H]

    # Layer 2 (re-associated): relu((A @ H) @ W2)
    #   A @ H stays a lane-dense MXU matmul; the width-1 W2 contraction is a
    #   VPU broadcast-multiply + XLU lane-reduce (MXU is the critical path,
    #   VPU/XLU slots have slack).
    z = jnp.dot(adj, h, preferred_element_type=jnp.float32)          # [N, H]
    logits = jnp.sum(z * w2_row_ref[...], axis=-1)                   # [N]
    # Lane-dense store: one [1, N] row per graph.
    out_ref[...] = jnp.maximum(logits, 0.0).reshape(1, -1)           # [1, N]


def gcn_forward_batched(x_batch, adj, w, w2):
    """x_batch: [G, N, F] -> [G, N, 1]. All graphs share `adj`, `w`, `w2`."""
    g, n, f = x_batch.shape
    hdim = w.shape[1]
    # Present W2 as a lane-dense [1, H] row for the in-kernel broadcast-multiply.
    w2_row = w2.reshape(1, hdim)

    flops = g * (2 * (n * n * f + n * f * hdim + n * n * hdim) + 3 * n * hdim)
    bytes_accessed = 4 * (x_batch.size + adj.size + w.size + w2_row.size + g * n)

    out_rows = pl.pallas_call(
        gcn_kernel,
        out_shape=jax.ShapeDtypeStruct((g, 1, n), jnp.float32),
        grid=(g,),
        in_specs=[
            # Per-graph feature block (leading graph dim squeezed away).
            pl.BlockSpec((None, n, f), lambda i: (i, 0, 0)),
            # Shared operands: constant block index -> fetched once, resident.
            pl.BlockSpec((n, n), lambda i: (0, 0)),        # adj
            pl.BlockSpec((f, hdim), lambda i: (0, 0)),     # W
            pl.BlockSpec((1, hdim), lambda i: (0, 0)),     # W2 row
        ],
        out_specs=pl.BlockSpec((None, 1, n), lambda i: (i, 0, 0)),
        compiler_params=pltpu.CompilerParams(
            dimension_semantics=("parallel",),
        ),
        cost_estimate=pl.CostEstimate(
            flops=int(flops), transcendentals=0, bytes_accessed=int(bytes_accessed)
        ),
    )(x_batch, adj, w, w2_row)

    # Restore the module contract: [G, 1, N] -> [G, N, 1].
    return jnp.transpose(out_rows, (0, 2, 1))


def gcn_forward(x, adj, w, w2):
    """Single-graph module contract: x [N, F] -> [N, 1]."""
    return gcn_forward_batched(x[None], adj, w, w2)[0]


if __name__ == "__main__":
    # Shapes implied by the module: X [N, features], adj [N, N],
    # weight [features, hidden], weight2 [hidden, 1]. Batch G graphs per call.
    G, N, FEATURES, HIDDEN = 8, 16, 8, 32

    key = jax.random.PRNGKey(0)
    k_x, k_adj, k_w, k_w2 = jax.random.split(key, 4)

    x_batch = jax.random.normal(k_x, (G, N, FEATURES), dtype=jnp.float32)

    # Simple symmetric, row-normalized adjacency (dense, non-negative).
    a_raw = (jax.random.uniform(k_adj, (N, N)) > 0.7).astype(jnp.float32)
    a_sym = jnp.maximum(a_raw, a_raw.T) + jnp.eye(N, dtype=jnp.float32)
    adj = a_sym / jnp.sum(a_sym, axis=1, keepdims=True)

    # PyTorch: weight.data.normal_(0, var) with var = 2/(out+in)  (std=var).
    std1 = 2.0 / (HIDDEN + FEATURES)
    std2 = 2.0 / (1 + HIDDEN)
    w = std1 * jax.random.normal(k_w, (FEATURES, HIDDEN), dtype=jnp.float32)
    w2 = std2 * jax.random.normal(k_w2, (HIDDEN, 1), dtype=jnp.float32)

    # Batched kernel call.
    out_b = gcn_forward_batched(x_batch, adj, w, w2)
    out_b = jax.block_until_ready(out_b)

    # Single-graph module-contract call.
    out_1 = gcn_forward(x_batch[0], adj, w, w2)
    out_1 = jax.block_until_ready(out_1)

    # Pure-JAX reference (original, non-reassociated formulation).
    def ref_gcn(xg):
        x1 = xg @ w
        x2 = jnp.maximum(adj @ x1, 0.0)
        x3 = x2 @ w2
        return jnp.maximum(adj @ x3, 0.0)

    ref_b = jax.vmap(ref_gcn)(x_batch)

    assert out_b.shape == (G, N, 1)
    assert out_1.shape == (N, 1)
    assert jnp.allclose(out_b, ref_b, atol=1e-5, rtol=1e-4)
    assert jnp.allclose(out_1, ref_b[0], atol=1e-5, rtol=1e-4)

    print("KERNEL_OK")
</pallas_src>

<mosaic_0001>
module attributes {stable_mosaic.version = 11 : i64} {
  func.func @gcn_kernel(%arg0: i32, %arg1: memref<1x16x8xf32, #tpu.memory_space<vmem>>, %arg2: memref<16x16xf32, #tpu.memory_space<vmem>>, %arg3: memref<8x32xf32, #tpu.memory_space<vmem>>, %arg4: memref<1x32xf32, #tpu.memory_space<vmem>>, %arg5: memref<1x1x16xf32, #tpu.memory_space<vmem>>) attributes {dimension_semantics = [#tpu.dimension_semantics<parallel>], iteration_bounds = array<i64: 8>, scalar_prefetch = 0 : i64, scratch_operands = 0 : i64, tpu.core_type = #tpu.core_type<tc>, window_params = [{transform_indices = @transform_0, window_bounds = array<i64: 1, 16, 8>}, {pipeline_mode = #tpu.pipeline_mode<synchronous>, transform_indices = @transform_1, window_bounds = array<i64: 16, 16>}, {pipeline_mode = #tpu.pipeline_mode<synchronous>, transform_indices = @transform_2, window_bounds = array<i64: 8, 32>}, {pipeline_mode = #tpu.pipeline_mode<synchronous>, transform_indices = @transform_3, window_bounds = array<i64: 1, 32>}, {transform_indices = @transform_4, window_bounds = array<i64: 1, 1, 16>}]} {
    %c0 = arith.constant 0 : index
    %c0_0 = arith.constant 0 : index
    %0 = vector.load %arg2[%c0, %c0_0] : memref<16x16xf32, #tpu.memory_space<vmem>>, vector<16x16xf32>
    %c0_1 = arith.constant 0 : index
    %c0_2 = arith.constant 0 : index
    %c0_3 = arith.constant 0 : index
    %1 = vector.load %arg1[%c0_1, %c0_2, %c0_3] : memref<1x16x8xf32, #tpu.memory_space<vmem>>, vector<1x16x8xf32>
    %2 = vector.shape_cast %1 : vector<1x16x8xf32> to vector<16x8xf32>
    %cst = arith.constant dense<0.000000e+00> : vector<16x8xf32>
    %3 = tpu.matmul %0, %2, %cst {dimension_numbers = #tpu.dot_dimension_numbers<[1], [0], [0], [1], [0, 0, 1, 1], [], []>} : vector<16x16xf32>, vector<16x8xf32>, vector<16x8xf32> -> vector<16x8xf32>
    %c0_4 = arith.constant 0 : index
    %c0_5 = arith.constant 0 : index
    %4 = vector.load %arg3[%c0_4, %c0_5] : memref<8x32xf32, #tpu.memory_space<vmem>>, vector<8x32xf32>
    %cst_6 = arith.constant dense<0.000000e+00> : vector<16x32xf32>
    %5 = tpu.matmul %3, %4, %cst_6 {dimension_numbers = #tpu.dot_dimension_numbers<[1], [0], [0], [1], [0, 0, 1, 1], [], []>} : vector<16x8xf32>, vector<8x32xf32>, vector<16x32xf32> -> vector<16x32xf32>
    %cst_7 = arith.constant 0.000000e+00 : f32
    %6 = vector.broadcast %cst_7 : f32 to vector<16x32xf32>
    %7 = arith.maximumf %5, %6 : vector<16x32xf32>
    %cst_8 = arith.constant dense<0.000000e+00> : vector<16x32xf32>
    %8 = tpu.matmul %0, %7, %cst_8 {dimension_numbers = #tpu.dot_dimension_numbers<[1], [0], [0], [1], [0, 0, 1, 1], [], []>} : vector<16x16xf32>, vector<16x32xf32>, vector<16x32xf32> -> vector<16x32xf32>
    %c0_9 = arith.constant 0 : index
    %c0_10 = arith.constant 0 : index
    %9 = vector.load %arg4[%c0_9, %c0_10] : memref<1x32xf32, #tpu.memory_space<vmem>>, vector<1x32xf32>
    %10 = vector.broadcast %9 : vector<1x32xf32> to vector<16x32xf32>
    %11 = arith.mulf %8, %10 : vector<16x32xf32>
    %cst_11 = arith.constant dense<0.000000e+00> : vector<16xf32>
    %12 = vector.multi_reduction <add>, %11, %cst_11 [1] : vector<16x32xf32> to vector<16xf32>
    %cst_12 = arith.constant 0.000000e+00 : f32
    %13 = vector.broadcast %cst_12 : f32 to vector<16xf32>
    %14 = arith.maximumf %12, %13 : vector<16xf32>
    %15 = vector.shape_cast %14 : vector<16xf32> to vector<1x16xf32>
    %c0_13 = arith.constant 0 : index
    %c0_14 = arith.constant 0 : index
    %c0_15 = arith.constant 0 : index
    %16 = vector.load %arg5[%c0_13, %c0_14, %c0_15] : memref<1x1x16xf32, #tpu.memory_space<vmem>>, vector<1x1x16xf32>
    %17 = vector.shape_cast %16 : vector<1x1x16xf32> to vector<1x16xf32>
    %18 = vector.shape_cast %15 : vector<1x16xf32> to vector<1x1x16xf32>
    tpu.vector_store %arg5[%c0_13, %c0_14, %c0_15], %18 {strides = array<i32>} : memref<1x1x16xf32, #tpu.memory_space<vmem>>, vector<1x1x16xf32>,
    return
  }
  func.func @transform_0(%arg0: i32) -> (i32, i32, i32) {
    %c0_i32 = arith.constant 0 : i32
    %c0_i32_0 = arith.constant 0 : i32
    %c0_i32_1 = arith.constant 0 : i32
    return %arg0, %c0_i32, %c0_i32_0 : i32, i32, i32
  }
  func.func @transform_1(%arg0: i32) -> (i32, i32) {
    %c0_i32 = arith.constant 0 : i32
    %c0_i32_0 = arith.constant 0 : i32
    %c0_i32_1 = arith.constant 0 : i32
    return %c0_i32, %c0_i32_0 : i32, i32
  }
  func.func @transform_2(%arg0: i32) -> (i32, i32) {
    %c0_i32 = arith.constant 0 : i32
    %c0_i32_0 = arith.constant 0 : i32
    %c0_i32_1 = arith.constant 0 : i32
    return %c0_i32, %c0_i32_0 : i32, i32
  }
  func.func @transform_3(%arg0: i32) -> (i32, i32) {
    %c0_i32 = arith.constant 0 : i32
    %c0_i32_0 = arith.constant 0 : i32
    %c0_i32_1 = arith.constant 0 : i32
    return %c0_i32, %c0_i32_0 : i32, i32
  }
  func.func @transform_4(%arg0: i32) -> (i32, i32, i32) {
    %c0_i32 = arith.constant 0 : i32
    %c0_i32_0 = arith.constant 0 : i32
    %c0_i32_1 = arith.constant 0 : i32
    return %arg0, %c0_i32, %c0_i32_0 : i32, i32, i32
  }
}

</mosaic_0001>

<bundles_post_ra>
// kernel: tpu_custom_call.1
= control target key start
LH: loop header
LB: loop body
LE: loop exit
PB: predicated region body
PF: predicated region fallthrough
CT: control target
= control target key end

     0   :  { %9 = vsyncpa [#allocation3], 0  ;;  %s845_s0 = inlined_call_operand.vmem [shape: f32[8,16,8], index: 0, kind: input, shape index: {}]   ;;  %s846_s1 = inlined_call_operand.vmem [shape: f32[16,16], index: 1, kind: input, shape index: {}]   ;;  %s847_s2 = inlined_call_operand.vmem [shape: f32[8,32], index: 2, kind: input, shape index: {}]   ;;  %s848_s3 = inlined_call_operand.vmem [shape: f32[1,32], index: 3, kind: input, shape index: {}]   ;;  %s849_s4 = inlined_call_operand.hbm [shape: f32[8,1,16], index: 4, kind: output, shape index: {}]  }
   0x1   :  { %11 = vsyncpa [#allocation3 + $0x1], 0  ;;  %s729_s15 = smov 0   ;;  %s731_s16 = smov 0  }
   0x2   :  { %s733_s17 = smov 0   ;;  %s735_s18 = smov 0  }
   0x3 LB: > { %s750_s19 = sadd.s32 4294967295, %s701_s18   ;;  %s545_s20 = sadd.s32 4294967294, %s701_s18   ;;  %s701_s18 = sphi %s735_s18, %s855_s18   ;;  %s697_s17 = sphi %s733_s17, %s854_s17   ;;  %s693_s16 = sphi %s731_s16, %s853_s16   ;;  %s689_s15 = sphi %s729_s15, %s852_s15  }
   0x4   : > { %s754_s21 = sadd.s32 1, %s701_s18   ;;  %s113_s22 = sadd.s32 1, %s697_s17 }
   0x5   : > { %s110_s23 = ssub.s32 %s701_s18, %s754_s21  ;;  %p123_p0 = scmp.ne.s32.totalorder %s697_s17, %s693_s16 }
   0x6   : > { %p111_p1 = scmp.eq.s32.totalorder %s110_s23, 0  ;;  %p124_p2 = scmp.eq.s32.totalorder %s750_s19, 7 }
   0x7   : > { %p129_p3 = scmp.ne.s32.totalorder %s693_s16, %s689_s15  ;;  %p130_p4 = scmp.eq.s32.totalorder %s545_s20, 7 }
   0x8   : > { %s765_s24 = scalar_select %p111_p1, %s697_s17, %s113_s22  }
   0x9   : > { %p767_p5 = por %p124_p2, %p123_p0  ;;  %p771_p6 = por %p130_p4, %p129_p3 }
   0xa   : > { %p548_p7 = scmp.ge.s32.totalorder %s701_s18, 1  ;;  %p165_p8 = scmp.lt.s32.totalorder %s701_s18, 9 }
   0xc   : > { %p166_p9 = pnand %p548_p7, %p165_p8 }
   0xd   : > { %p190_p10 = scmp.lt.s32.totalorder (!%p166_p9), %s750_s19, 7  ;;  %v195_v0 = vld [vmem:[%s846_s1] sm:$0xff] (!%p166_p9)  ;;  %vm199_vm0 = vcmask (!%p166_p9), 130048   ;;  %v196_v4 = vld [vmem:[%s846_s1 + $0x8] sm:$0xff] (!%p166_p9)  ;;  %vm282_vm1 = vcmask (!%p166_p9), 64512   ;;  %vm450_vm2 = vcmask (!%p166_p9), 261120   ;;  %v461_v20 = vlaneseq (!%p166_p9) }
   0xe   : > { %169 = sbr.rel (%p166_p9) target bundleno = 848 (0x350), region = 36  ;;  %577 = vmatprep.mubr.msk.f32.mxu0 (!%p166_p9), %vm199_vm0, %v195_v0  ;;  %v281_v5 = vld [vmem:[%s847_s2] sm:$0xff] (!%p166_p9)  ;;  %s188_s14 = sand.u32 (!%p166_p9), 1, %s693_s16   ;;  %vm472_vm3 = vcmask (!%p166_p9), 130112   ;;  %vm475_vm4 = vcmask (!%p166_p9), 122880  }
   0xf   : > { %580 = vmatprep.subr.mxu1 (!%p166_p9), %v281_v5  ;;  %v557_v13 = vld [vmem:[%s848_s3] ss:$0 sm:$0xff] (!%p166_p9)  ;;  %v462_v21 = vand.u32 (!%p166_p9), 127, %v461_v20  ;;  %v464_v22 = vshrl.u32 (!%p166_p9), %v461_v20, 7  ;;  %s558_s20 = sshll.u32 (!%p166_p9), %s750_s19, 4  ;;  %s189_s22 = scalar_lea.vmem (!%p166_p9), [#allocation2], %s188_s14 }
  0x10   : > { %581 = vmatpush3.msra.mxu1 (!%p166_p9), %v281_v5  ;;  %s490_s23 = sshll.u32 (!%p166_p9), %s189_s22, 4  ;;  %s703_s5 = smov (!%p166_p9), [#allocation2]   ;;  %s805_s23 = int_to_ptr.vmem [resolvable:$true] %s490_s23 }
  0x11   : > { %v467_v23 = vadd.s32 (!%p166_p9), 4294967288, %v462_v21  ;;  %v465_v25 = vsub.s32 (!%p166_p9), %v462_v21, %v464_v22  ;;  %s643_s6 = sshll.u32 (!%p166_p9), %s703_s5, 4  ;;  %s644_s6 = int_to_ptr.vmem [resolvable:$false] %s643_s6 }
  0x12   : > { %p646_p0 = scmp.lt.s32.totalorder (!%p166_p9), %s805_s23, %s644_s6 }
  0x13   : > { %v470_v27 = vsub.s32 (!%p166_p9), %v467_v23, %v464_v22 }
  0x15   : > { %s191_s29 = scalar_select %p190_p10, %s750_s19, 7 }
  0x16   : > { %s639_s19 = scalar_lea.vmem %s805_s23, 16 }
  0x17   : > { %s561_s30 = sshll.u32 %s191_s29, 4  ;;  %s803_s29 = scalar_lea.hbm %s849_s4, %s558_s20 }
  0x18   : > { %s194_s7 = scalar_lea.vmem %s845_s0, %s561_s30  ;;  %s478_s30 = scalar_lea.sflag [#allocation3], %s188_s14 }
  0x19   : > { %v197_v1 = vld [vmem:[%s194_s7] sm:$0xff]  ;;  %v198_v2 = vld [vmem:[%s194_s7 + $0x8] sm:$0xff]  ;;  %p640_p11 = scmp.ne.s32.totalorder %s805_s23, %s639_s19  ;;  %s645_s7 = scalar_lea.vmem %s644_s6, 32 }
  0x1a   : > { %v592_v3 = vpack.c.bf16 %v198_v2, %v197_v1  ;;  %p647_p1 = scmp.lt.s32.totalorder %s645_s7, %s639_s19 }
  0x1b   : > { %p641_p12 = pnand %p640_p11, %p767_p5 }
  0x1c   : > { %593 = vmatprep.subr.bf16.mxu0 %v592_v3  ;;  %p648_p2 = por %p647_p1, %p646_p0 }
  0x1d   : > { %595 = vmatpush3.bf16.msra.mxu0 %v592_v3  ;;  %p642_p13 = pneg %p641_p12 }
  0x1f   : > { %p649_p3 = pnand %p648_p2, %p642_p13 }
  0x20   : > { %578 = vmatmul.mubr.msk.f32.vlgmr.msra.gmra.mrb[0].mxu0 %vm199_vm0, %v196_v4 }
  0xf3   : > { %v579_v6 = vpop.f32.mrb[0].mxu0 }
  0xf4   : > { %v272_v7 = vpop.f32.mrb[1].mxu0 }
  0xf5   : > { %582 = vmatprep.mubr.msk.f32.mxu1 %vm282_vm1, %v272_v7 }
  0xf6   : > { %583 = vmatmul.mubr.msk.f32.vlgmr.msra.gmra.mrb[0].mxu1 %vm282_vm1, %v579_v6 }
  0xf7   : > { %589 = vmatprep.mubr.msk.f32.mxu1 %vm199_vm0, %v195_v0 }
 0x1c9   : > { %v584_v8 = vpop.f32.mrb[0].mxu1 }
 0x1ca   : > { %v365_v9 = vmax.f32 %v584_v8, 0.0  ;;  %v355_v10 = vpop.f32.mrb[1].mxu1 }
 0x1cb   : > { %v364_v11 = vmax.f32 %v355_v10, 0.0 }
 0x1cd   : > { %v596_v12 = vpack.c.bf16 %v365_v9, %v364_v11 }
 0x1cf   : > { %597 = vmatprep.subr.bf16.mxu1 %v596_v12 }
 0x1d0   : > { %599 = vmatpush3.bf16.msra.mxu1 %v596_v12 }
 0x1d3   : > { %590 = vmatmul.mubr.msk.f32.vlgmr.msra.gmra.mrb[2].mxu1 %vm199_vm0, %v196_v4 }
 0x2a6   : > { %v591_v14 = vpop.f32.mrb[2].mxu1 }
 0x2a7   : > { %v432_v15 = vpop.f32.mrb[3].mxu1  ;;  %v449_v17 = vmul.f32 %v591_v14, %v557_v13 }
 0x2a8   : > { %v448_v16 = vmul.f32 %v557_v13, %v432_v15 }
 0x2a9   : > { %v454_v19 = vsel %vm450_vm2, %v449_v17, 0.0 }
 0x2aa   : > { %v451_v18 = vsel %vm450_vm2, %v448_v16, 0.0 }
 0x2ab   : > { %452 = vadd.xlane.f32.xlu0 %v451_v18 }
 0x2af   : > { %455 = vadd.xlane.f32.xlu0 %v454_v19 }
 0x338   : > { %v453_v24 = vpop.xlane.xlu0 %452 }
 0x339   : > { %v457_v26 = vmax.f32 %v453_v24, 0.0 }
 0x33b   : > { %v466_v30 = vrot.slane %v457_v26, %v465_v25 }
 0x33c   : > { %v456_v28 = vpop.xlane.xlu0 %455 }
 0x33d   : > { %v458_v29 = vmax.f32 %v456_v28, 0.0 }
 0x33f   : > { %v471_v31 = vrot.slane %v458_v29, %v470_v27 }
 0x341   : > { %v473_v32 = vsel %vm472_vm3, %v471_v31, %v466_v30 }
 0x342   : > { %476 = vst.msk [vmem:[%s189_s22] sm:$0x1] %vm475_vm4, %v473_v32 }
 0x343   : > { %652 = shalt.err (!%p649_p3)
}
 0x344   : > { %s653_s8 = scalar_lea.hbm %s803_s29, 16  ;;  %s657_s11 = scalar_lea.hbm %s849_s4, 128 }
 0x345   : > { %p654_p4 = scmp.ne.s32.totalorder %s803_s29, %s653_s8  ;;  %p658_p9 = scmp.lt.u32.totalorder %s803_s29, %s849_s4 }
 0x346   : > { %p659_p10 = scmp.lt.u32.totalorder %s657_s11, %s653_s8  ;;  %p661_p12 = scmp.lt.u32.totalorder %s653_s8, %s803_s29 }
 0x347   : > { %p655_p7 = pnand %p654_p4, %p767_p5 }
 0x348   : > { %p660_p11 = por %p659_p10, %p658_p9 }
 0x349   : > { %p656_p8 = pneg %p655_p7 }
 0x34a   : > { %p662_p13 = por %p661_p12, %p660_p11 }
 0x34c   : > { %p663_p0 = pnand %p662_p13, %p656_p8 }
 0x34e   : > { %666 = shalt.err (!%p663_p0)
}
 0x34f   : > { %600 = dma.vmem_to_hbm [thread:$0]  (%p767_p5), %s805_s23, 16, %s803_s29, %s478_s30  }
 0x350 PF: > { %p606_p1 = scmp.ge.s32.totalorder %s701_s18, 2  ;;  %s502_s14 = sand.u32 1, %s689_s15  }
 0x351   : > { %s503_s20 = scalar_lea.sflag [#allocation3], %s502_s14 }
 0x352   : > { %p603_p2 = pnand %p606_p1, %p771_p6 }
 0x354   : > { %684 = dma.done.wait (!%p603_p2), %s503_s20, 16  }
 0x355   : > { %686 = vsyncadd (!%p603_p2), %s503_s20, 4294967280  ;;  %p14_p3 = scmp.ge.s32.totalorder %s754_s21, 10   ;;  %s852_s15 = smov %s693_s16 }
 0x356   : > { %s853_s16 = smov %s697_s17  ;;  %s854_s17 = smov %s765_s24 }
 0x357   : > { %s855_s18 = smov %s754_s21  ;;  %16 = sbr.rel (!%p14_p3) target bundleno = 3 (0x3), region = 71 }
 0x35e   :  { %507 = vsyncpa [#allocation3], 1 }
 0x35f   :  { %509 = vsyncpa [#allocation3 + $0x1], 1 }

</bundles_post_ra>
